<compile_context>
chip_gen: v7x
topology: tpu7x:2x2x1
jax: 0.10.0
libtpu: 0.0.40
codegen_flags: <defaults>
</compile_context>

<pallas_src>
import functools

import jax
import jax.numpy as jnp
from jax.experimental import pallas as pl
from jax.experimental.pallas import tpu as pltpu

LN_EPS = 1e-5  # PyTorch nn.LayerNorm default


def _patch_embed_kernel(x_ref, g1_ref, b1_ref, w_ref, bw_ref, g2_ref, b2_ref, o_ref):
    """One token-tile of: LN(patch_dim) -> Linear(MXU, bf16 in / f32 acc) -> LN(d_model)."""
    x = x_ref[...]                                            # (tm, patch_dim) f32

    # LayerNorm over patch_dim (f32; reductions -> XLU, rsqrt -> EUP)
    mu = jnp.mean(x, axis=-1, keepdims=True)
    xc = x - mu
    var = jnp.mean(xc * xc, axis=-1, keepdims=True)
    xn = xc * jax.lax.rsqrt(var + LN_EPS)
    xn = xn * g1_ref[...] + b1_ref[...]                       # (tm, patch_dim)

    # Linear: bf16 operands into the MXU, f32 accumulation.
    y = jnp.dot(xn.astype(jnp.bfloat16), w_ref[...],
                preferred_element_type=jnp.float32) + bw_ref[...]

    # LayerNorm over d_model
    mu2 = jnp.mean(y, axis=-1, keepdims=True)
    yc = y - mu2
    var2 = jnp.mean(yc * yc, axis=-1, keepdims=True)
    yn = yc * jax.lax.rsqrt(var2 + LN_EPS)
    o_ref[...] = (yn * g2_ref[...] + b2_ref[...]).astype(o_ref.dtype)


def patch_embedding_forward(x, params, *, patch_height, patch_width, tm=512):
    """x: (B, N, C, H, W) float32.  Returns (B, N, h*w, d_model)."""
    B, N, C, H, W = x.shape
    p1, p2 = patch_height, patch_width
    h, w = H // p1, W // p2
    patch_dim = C * p1 * p2
    d_model = params["w"].shape[1]

    # Rearrange 'b n c (h p1) (w p2) -> b n (h w) (p1 p2 c)'  (layout-only, fused by jit)
    xr = x.reshape(B, N, C, h, p1, w, p2)
    xr = jnp.transpose(xr, (0, 1, 3, 5, 4, 6, 2))             # (B, N, h, w, p1, p2, C)
    xr = xr.reshape(B, N, h * w, patch_dim)

    tokens = B * N * h * w
    x_flat = xr.reshape(tokens, patch_dim)

    # ---- tile-size selection / VMEM budgeting (sized for v7x 64 MiB physical) ------
    tm = max(8, min(tm, pl.cdiv(tokens, 8) * 8))              # clamp; keep multiple of 8

    def _vmem_est(t):
        act = 2 * t * (patch_dim + d_model) * 4               # double-buffered in/out tiles
        wgt = 2 * patch_dim * d_model * 2                     # bf16 weight (2 buffers)
        tmp = 4 * t * max(patch_dim, d_model) * 4             # in-kernel f32 temporaries
        return act + wgt + tmp

    VMEM_BUDGET = 48 * 1024 * 1024                            # headroom below 64 MiB
    while tm > 64 and _vmem_est(tm) > VMEM_BUDGET:
        tm //= 2
    vmem_limit = int(max(32 * 1024 * 1024,
                         min(2 * _vmem_est(tm), 64 * 1024 * 1024)))

    # Pad tokens to a tile multiple (replaces the old divisibility assert); padded rows
    # are zeros, flow through LN/Linear harmlessly, and are sliced away afterwards.
    tokens_padded = pl.cdiv(tokens, tm) * tm
    if tokens_padded != tokens:
        x_flat = jnp.pad(x_flat, ((0, tokens_padded - tokens), (0, 0)))

    grid = (tokens_padded // tm,)

    # Parameter views as 2-D rows so they broadcast cleanly inside the kernel.
    g1 = params["ln1_g"].reshape(1, patch_dim)
    b1 = params["ln1_b"].reshape(1, patch_dim)
    wmat = params["w"].astype(jnp.bfloat16)                   # bf16 MXU operand (once)
    bw = params["b"].reshape(1, d_model)
    g2 = params["ln2_g"].reshape(1, d_model)
    b2 = params["ln2_b"].reshape(1, d_model)

    out_flat = pl.pallas_call(
        _patch_embed_kernel,
        out_shape=jax.ShapeDtypeStruct((tokens_padded, d_model), x.dtype),
        grid_spec=pltpu.PrefetchScalarGridSpec(
            num_scalar_prefetch=0,
            grid=grid,
            in_specs=[
                pl.BlockSpec((tm, patch_dim), lambda i: (i, 0)),       # x tile
                pl.BlockSpec((1, patch_dim), lambda i: (0, 0)),        # ln1 gamma
                pl.BlockSpec((1, patch_dim), lambda i: (0, 0)),        # ln1 beta
                pl.BlockSpec((patch_dim, d_model), lambda i: (0, 0)),  # linear W (bf16)
                pl.BlockSpec((1, d_model), lambda i: (0, 0)),          # linear bias
                pl.BlockSpec((1, d_model), lambda i: (0, 0)),          # ln2 gamma
                pl.BlockSpec((1, d_model), lambda i: (0, 0)),          # ln2 beta
            ],
            out_specs=pl.BlockSpec((tm, d_model), lambda i: (i, 0)),   # lane-dense out
        ),
        compiler_params=pltpu.CompilerParams(
            dimension_semantics=("parallel",),                # megacore-shardable axis
            vmem_limit_bytes=vmem_limit),
    )(x_flat, g1, b1, wmat, bw, g2, b2)

    out_flat = out_flat[:tokens]
    return out_flat.reshape(B, N, h * w, d_model)


def init_params(key, *, channels, patch_height, patch_width, d_model):
    patch_dim = channels * patch_height * patch_width
    k_w, k_b = jax.random.split(key)
    bound = 1.0 / jnp.sqrt(patch_dim)
    return {
        "ln1_g": jnp.ones((patch_dim,), jnp.float32),
        "ln1_b": jnp.zeros((patch_dim,), jnp.float32),
        # stored as (patch_dim, d_model) = W.T relative to torch's (d_model, patch_dim)
        "w": jax.random.uniform(k_w, (patch_dim, d_model), jnp.float32, -bound, bound),
        "b": jax.random.uniform(k_b, (d_model,), jnp.float32, -bound, bound),
        "ln2_g": jnp.ones((d_model,), jnp.float32),
        "ln2_b": jnp.zeros((d_model,), jnp.float32),
    }


def _reference(x, params, *, patch_height, patch_width):
    """Pure-JAX f32 reference matching the PyTorch module."""
    B, N, C, H, W = x.shape
    p1, p2 = patch_height, patch_width
    h, w = H // p1, W // p2
    patch_dim = C * p1 * p2
    xr = x.reshape(B, N, C, h, p1, w, p2)
    xr = jnp.transpose(xr, (0, 1, 3, 5, 4, 6, 2)).reshape(B, N, h * w, patch_dim)

    def ln(v, g, b):
        mu = jnp.mean(v, -1, keepdims=True)
        var = jnp.mean((v - mu) ** 2, -1, keepdims=True)
        return (v - mu) * jax.lax.rsqrt(var + LN_EPS) * g + b

    y = ln(xr, params["ln1_g"], params["ln1_b"])
    y = y @ params["w"] + params["b"]
    return ln(y, params["ln2_g"], params["ln2_b"])


if __name__ == "__main__":
    # Small demo shapes: batch=2, num_images_in_video=3, channels=4, H=W=16,
    # patch 4x4 -> patch_dim=64, 16 patches/frame, tokens=96, d_model=128 (lane-dense).
    # tm=64 here exercises the multi-step grid + padded-tail path (96 -> 128 rows).
    B, N, C, H, W = 2, 3, 4, 16, 16
    p1 = p2 = 4
    d_model = 128

    key = jax.random.PRNGKey(0)
    k_x, k_p = jax.random.split(key)
    x = jax.random.normal(k_x, (B, N, C, H, W), jnp.float32)
    params = init_params(k_p, channels=C, patch_height=p1, patch_width=p2,
                         d_model=d_model)

    fwd = jax.jit(functools.partial(patch_embedding_forward,
                                    patch_height=p1, patch_width=p2, tm=64))
    out = jax.block_until_ready(fwd(x, params))

    ref = _reference(x, params, patch_height=p1, patch_width=p2)
    assert out.shape == (B, N, (H // p1) * (W // p2), d_model), out.shape
    # bf16 MXU operands with f32 accumulation -> loosened tolerance vs pure-f32 reference.
    max_err = float(jnp.max(jnp.abs(out - ref)))
    assert max_err < 5e-2, max_err

    print("KERNEL_OK")
</pallas_src>

<mosaic_0001>
module attributes {stable_mosaic.version = 11 : i64} {
  func.func @_patch_embed_kernel(%arg0: i32, %arg1: memref<64x64xf32, #tpu.memory_space<vmem>>, %arg2: memref<1x64xf32, #tpu.memory_space<vmem>>, %arg3: memref<1x64xf32, #tpu.memory_space<vmem>>, %arg4: memref<64x128xbf16, #tpu.memory_space<vmem>>, %arg5: memref<1x128xf32, #tpu.memory_space<vmem>>, %arg6: memref<1x128xf32, #tpu.memory_space<vmem>>, %arg7: memref<1x128xf32, #tpu.memory_space<vmem>>, %arg8: memref<64x128xf32, #tpu.memory_space<vmem>>) attributes {dimension_semantics = [#tpu.dimension_semantics<parallel>], iteration_bounds = array<i64: 2>, scalar_prefetch = 0 : i64, scratch_operands = 0 : i64, tpu.core_type = #tpu.core_type<tc>, window_params = [{transform_indices = @transform_0, window_bounds = array<i64: 64, 64>}, {pipeline_mode = #tpu.pipeline_mode<synchronous>, transform_indices = @transform_1, window_bounds = array<i64: 1, 64>}, {pipeline_mode = #tpu.pipeline_mode<synchronous>, transform_indices = @transform_2, window_bounds = array<i64: 1, 64>}, {pipeline_mode = #tpu.pipeline_mode<synchronous>, transform_indices = @transform_3, window_bounds = array<i64: 64, 128>}, {pipeline_mode = #tpu.pipeline_mode<synchronous>, transform_indices = @transform_4, window_bounds = array<i64: 1, 128>}, {pipeline_mode = #tpu.pipeline_mode<synchronous>, transform_indices = @transform_5, window_bounds = array<i64: 1, 128>}, {pipeline_mode = #tpu.pipeline_mode<synchronous>, transform_indices = @transform_6, window_bounds = array<i64: 1, 128>}, {transform_indices = @transform_7, window_bounds = array<i64: 64, 128>}]} {
    %c0 = arith.constant 0 : index
    %c0_0 = arith.constant 0 : index
    %0 = vector.load %arg1[%c0, %c0_0] : memref<64x64xf32, #tpu.memory_space<vmem>>, vector<64x64xf32>
    %cst = arith.constant dense<0.000000e+00> : vector<64xf32>
    %1 = vector.multi_reduction <add>, %0, %cst [1] : vector<64x64xf32> to vector<64xf32>
    %2 = vector.shape_cast %1 : vector<64xf32> to vector<64x1xf32>
    %cst_1 = arith.constant 6.400000e+01 : f32
    %3 = vector.broadcast %cst_1 : f32 to vector<64x1xf32>
    %4 = arith.divf %2, %3 : vector<64x1xf32>
    %5 = vector.broadcast %4 : vector<64x1xf32> to vector<64x64xf32>
    %6 = arith.subf %0, %5 : vector<64x64xf32>
    %7 = arith.mulf %6, %6 : vector<64x64xf32>
    %cst_2 = arith.constant dense<0.000000e+00> : vector<64xf32>
    %8 = vector.multi_reduction <add>, %7, %cst_2 [1] : vector<64x64xf32> to vector<64xf32>
    %9 = vector.shape_cast %8 : vector<64xf32> to vector<64x1xf32>
    %cst_3 = arith.constant 6.400000e+01 : f32
    %10 = vector.broadcast %cst_3 : f32 to vector<64x1xf32>
    %11 = arith.divf %9, %10 : vector<64x1xf32>
    %cst_4 = arith.constant 9.99999974E-6 : f32
    %12 = vector.broadcast %cst_4 : f32 to vector<64x1xf32>
    %13 = arith.addf %11, %12 : vector<64x1xf32>
    %14 = math.rsqrt %13 : vector<64x1xf32>
    %15 = vector.broadcast %14 : vector<64x1xf32> to vector<64x64xf32>
    %16 = arith.mulf %6, %15 : vector<64x64xf32>
    %c0_5 = arith.constant 0 : index
    %c0_6 = arith.constant 0 : index
    %17 = vector.load %arg2[%c0_5, %c0_6] : memref<1x64xf32, #tpu.memory_space<vmem>>, vector<1x64xf32>
    %18 = vector.broadcast %17 : vector<1x64xf32> to vector<64x64xf32>
    %19 = arith.mulf %16, %18 : vector<64x64xf32>
    %c0_7 = arith.constant 0 : index
    %c0_8 = arith.constant 0 : index
    %20 = vector.load %arg3[%c0_7, %c0_8] : memref<1x64xf32, #tpu.memory_space<vmem>>, vector<1x64xf32>
    %21 = vector.broadcast %20 : vector<1x64xf32> to vector<64x64xf32>
    %22 = arith.addf %19, %21 : vector<64x64xf32>
    %23 = arith.truncf %22 : vector<64x64xf32> to vector<64x64xbf16>
    %c0_9 = arith.constant 0 : index
    %c0_10 = arith.constant 0 : index
    %24 = vector.load %arg4[%c0_9, %c0_10] : memref<64x128xbf16, #tpu.memory_space<vmem>>, vector<64x128xbf16>
    %cst_11 = arith.constant dense<0.000000e+00> : vector<64x128xf32>
    %25 = tpu.matmul %23, %24, %cst_11 {dimension_numbers = #tpu.dot_dimension_numbers<[1], [0], [0], [1], [0, 0, 1, 1], [], []>} : vector<64x64xbf16>, vector<64x128xbf16>, vector<64x128xf32> -> vector<64x128xf32>
    %c0_12 = arith.constant 0 : index
    %c0_13 = arith.constant 0 : index
    %26 = vector.load %arg5[%c0_12, %c0_13] : memref<1x128xf32, #tpu.memory_space<vmem>>, vector<1x128xf32>
    %27 = vector.broadcast %26 : vector<1x128xf32> to vector<64x128xf32>
    %28 = arith.addf %25, %27 : vector<64x128xf32>
    %cst_14 = arith.constant dense<0.000000e+00> : vector<64xf32>
    %29 = vector.multi_reduction <add>, %28, %cst_14 [1] : vector<64x128xf32> to vector<64xf32>
    %30 = vector.shape_cast %29 : vector<64xf32> to vector<64x1xf32>
    %cst_15 = arith.constant 1.280000e+02 : f32
    %31 = vector.broadcast %cst_15 : f32 to vector<64x1xf32>
    %32 = arith.divf %30, %31 : vector<64x1xf32>
    %33 = vector.broadcast %32 : vector<64x1xf32> to vector<64x128xf32>
    %34 = arith.subf %28, %33 : vector<64x128xf32>
    %35 = arith.mulf %34, %34 : vector<64x128xf32>
    %cst_16 = arith.constant dense<0.000000e+00> : vector<64xf32>
    %36 = vector.multi_reduction <add>, %35, %cst_16 [1] : vector<64x128xf32> to vector<64xf32>
    %37 = vector.shape_cast %36 : vector<64xf32> to vector<64x1xf32>
    %cst_17 = arith.constant 1.280000e+02 : f32
    %38 = vector.broadcast %cst_17 : f32 to vector<64x1xf32>
    %39 = arith.divf %37, %38 : vector<64x1xf32>
    %cst_18 = arith.constant 9.99999974E-6 : f32
    %40 = vector.broadcast %cst_18 : f32 to vector<64x1xf32>
    %41 = arith.addf %39, %40 : vector<64x1xf32>
    %42 = math.rsqrt %41 : vector<64x1xf32>
    %43 = vector.broadcast %42 : vector<64x1xf32> to vector<64x128xf32>
    %44 = arith.mulf %34, %43 : vector<64x128xf32>
    %c0_19 = arith.constant 0 : index
    %c0_20 = arith.constant 0 : index
    %45 = vector.load %arg6[%c0_19, %c0_20] : memref<1x128xf32, #tpu.memory_space<vmem>>, vector<1x128xf32>
    %46 = vector.broadcast %45 : vector<1x128xf32> to vector<64x128xf32>
    %47 = arith.mulf %44, %46 : vector<64x128xf32>
    %c0_21 = arith.constant 0 : index
    %c0_22 = arith.constant 0 : index
    %48 = vector.load %arg7[%c0_21, %c0_22] : memref<1x128xf32, #tpu.memory_space<vmem>>, vector<1x128xf32>
    %49 = vector.broadcast %48 : vector<1x128xf32> to vector<64x128xf32>
    %50 = arith.addf %47, %49 : vector<64x128xf32>
    %c0_23 = arith.constant 0 : index
    %c0_24 = arith.constant 0 : index
    %51 = vector.load %arg8[%c0_23, %c0_24] : memref<64x128xf32, #tpu.memory_space<vmem>>, vector<64x128xf32>
    tpu.vector_store %arg8[%c0_23, %c0_24], %50 {strides = array<i32>} : memref<64x128xf32, #tpu.memory_space<vmem>>, vector<64x128xf32>,
    return
  }
  func.func @transform_0(%arg0: i32) -> (i32, i32) {
    %c0_i32 = arith.constant 0 : i32
    %c0_i32_0 = arith.constant 0 : i32
    return %arg0, %c0_i32 : i32, i32
  }
  func.func @transform_1(%arg0: i32) -> (i32, i32) {
    %c0_i32 = arith.constant 0 : i32
    %c0_i32_0 = arith.constant 0 : i32
    %c0_i32_1 = arith.constant 0 : i32
    return %c0_i32, %c0_i32_0 : i32, i32
  }
  func.func @transform_2(%arg0: i32) -> (i32, i32) {
    %c0_i32 = arith.constant 0 : i32
    %c0_i32_0 = arith.constant 0 : i32
    %c0_i32_1 = arith.constant 0 : i32
    return %c0_i32, %c0_i32_0 : i32, i32
  }
  func.func @transform_3(%arg0: i32) -> (i32, i32) {
    %c0_i32 = arith.constant 0 : i32
    %c0_i32_0 = arith.constant 0 : i32
    %c0_i32_1 = arith.constant 0 : i32
    return %c0_i32, %c0_i32_0 : i32, i32
  }
  func.func @transform_4(%arg0: i32) -> (i32, i32) {
    %c0_i32 = arith.constant 0 : i32
    %c0_i32_0 = arith.constant 0 : i32
    %c0_i32_1 = arith.constant 0 : i32
    return %c0_i32, %c0_i32_0 : i32, i32
  }
  func.func @transform_5(%arg0: i32) -> (i32, i32) {
    %c0_i32 = arith.constant 0 : i32
    %c0_i32_0 = arith.constant 0 : i32
    %c0_i32_1 = arith.constant 0 : i32
    return %c0_i32, %c0_i32_0 : i32, i32
  }
  func.func @transform_6(%arg0: i32) -> (i32, i32) {
    %c0_i32 = arith.constant 0 : i32
    %c0_i32_0 = arith.constant 0 : i32
    %c0_i32_1 = arith.constant 0 : i32
    return %c0_i32, %c0_i32_0 : i32, i32
  }
  func.func @transform_7(%arg0: i32) -> (i32, i32) {
    %c0_i32 = arith.constant 0 : i32
    %c0_i32_0 = arith.constant 0 : i32
    return %arg0, %c0_i32 : i32, i32
  }
}

</mosaic_0001>

<bundles_post_ra>
// kernel: patch_embedding_forward.1
= control target key start
LH: loop header
LB: loop body
LE: loop exit
PB: predicated region body
PF: predicated region fallthrough
CT: control target
= control target key end

     0   :  { %s878_s24 = smov 0   ;;  %s1039_s0 = inlined_call_operand.vmem [shape: f32[128,64], index: 0, kind: input, shape index: {}]   ;;  %s1040_s1 = inlined_call_operand.vmem [shape: f32[1,64], index: 1, kind: input, shape index: {}]   ;;  %s1041_s2 = inlined_call_operand.vmem [shape: f32[1,64], index: 2, kind: input, shape index: {}]   ;;  %s1042_s3 = inlined_call_operand.vmem [shape: bf16[64,128], index: 3, kind: input, shape index: {}]   ;;  %s1043_s4 = inlined_call_operand.vmem [shape: f32[1,128], index: 4, kind: input, shape index: {}]   ;;  %s1044_s5 = inlined_call_operand.vmem [shape: f32[1,128], index: 5, kind: input, shape index: {}]   ;;  %s1045_s6 = inlined_call_operand.vmem [shape: f32[1,128], index: 6, kind: input, shape index: {}]   ;;  %s1046_s7 = inlined_call_operand.vmem [shape: f32[128,128], index: 7, kind: output, shape index: {}]  }
   0x1 LB: > { %s730_s25 = sadd.s32 4294967295, %s836_s24   ;;  %p734_p0 = scmp.ge.s32.totalorder %s836_s24, 1  ;;  %s836_s24 = sphi %s878_s24, %s17_s24  }
   0x2   : > { %p238_p1 = scmp.lt.s32.totalorder %s836_s24, 3 }
   0x4   : > { %p239_p2 = pnand %p734_p0, %p238_p1 }
   0x5   : > { %s735_s26 = sshll.u32 (!%p239_p2), %s730_s25, 3  ;;  %vm291_vm0 = vcmask (!%p239_p2), 523264   ;;  %v794_v56 = vld [vmem:[%s1042_s3] sm:$0xff] (!%p239_p2)   ;;  %v795_v57 = vld [vmem:[%s1042_s3 + $0x8] sm:$0xff] (!%p239_p2)   ;;  %v796_v58 = vld [vmem:[%s1042_s3 + $0x10] sm:$0xff] (!%p239_p2)  }
   0x6   : > { %242 = sbr.rel (%p239_p2) target bundleno = 884 (0x374), region = 48  ;;  %p271_p3 = scmp.lt.s32.totalorder (!%p239_p2), %s735_s26, 15  ;;  %762 = vmatprep.subr.bf16.mxu0 (!%p239_p2), %v794_v56  ;;  %778 = vmatprep.subr.bf16.mxu1 (!%p239_p2), %v794_v56  ;;  %v797_v59 = vld [vmem:[%s1042_s3 + $0x18] sm:$0xff] (!%p239_p2)  }
   0x7   : > { %763 = vmatpush3.bf16.msra.mxu0 (!%p239_p2), %v794_v56  ;;  %782 = vmatpush3.bf16.msra.mxu1 (!%p239_p2), %v794_v56 }
   0x8   : > { %764 = vmatprep.subr.bf16.mxu0 (!%p239_p2), %v795_v57  ;;  %779 = vmatprep.subr.bf16.mxu1 (!%p239_p2), %v795_v57 }
   0xb   : > { %765 = vmatpush3.bf16.msra.mxu0 (!%p239_p2), %v795_v57  ;;  %783 = vmatpush3.bf16.msra.mxu1 (!%p239_p2), %v795_v57 }
   0xc   : > { %766 = vmatprep.subr.bf16.mxu0 (!%p239_p2), %v796_v58  ;;  %780 = vmatprep.subr.bf16.mxu1 (!%p239_p2), %v796_v58 }
   0xd   : > { %s1048_s26 = smov (!%p271_p3, %s735_s26), 15 }
   0xe   : > { %s736_s27 = sshll.u32 %s1048_s26, 3 }
   0xf   : > { %s274_s30 = scalar_lea.vmem %s1039_s0, %s736_s27  ;;  %767 = vmatpush3.bf16.msra.mxu0 %v796_v58  ;;  %784 = vmatpush3.bf16.msra.mxu1 %v796_v58  ;;  %s1020_s8 = scalar_lea.vmem %s1046_s7, %s736_s27 }
  0x10   : > { %v283_v0 = vld [vmem:[%s274_s30] sm:$0xff]  ;;  %v284_v2 = vld [vmem:[%s274_s30 + $0x8] sm:$0xff]  ;;  %v285_v8 = vld [vmem:[%s274_s30 + $0x10] sm:$0xff]  ;;  %768 = vmatprep.subr.bf16.mxu0 %v797_v59  ;;  %781 = vmatprep.subr.bf16.mxu1 %v797_v59 }
  0x11   : > { %v287_v1 = vld [vmem:[%s274_s30 + $0x20] sm:$0xff]  ;;  %v292_v3 = vsel %vm291_vm0, %v283_v0, 0.0  ;;  %v288_v5 = vld [vmem:[%s274_s30 + $0x28] sm:$0xff]  ;;  %v295_v6 = vsel %vm291_vm0, %v284_v2, 0.0  ;;  %v286_v9 = vld [vmem:[%s274_s30 + $0x18] sm:$0xff]  ;;  %v298_v10 = vsel %vm291_vm0, %v285_v8, 0.0 }
  0x12   : > { %v304_v4 = vsel %vm291_vm0, %v287_v1, 0.0  ;;  %293 = vadd.xlane.f32.xlu0 %v292_v3  ;;  %v307_v7 = vsel %vm291_vm0, %v288_v5, 0.0  ;;  %v301_v11 = vsel %vm291_vm0, %v286_v9, 0.0  ;;  %v289_v12 = vld [vmem:[%s274_s30 + $0x30] sm:$0xff]  ;;  %v290_v13 = vld [vmem:[%s274_s30 + $0x38] sm:$0xff] }
  0x13   : > { %305 = vadd.xlane.f32.xlu1 %v304_v4  ;;  %v310_v14 = vsel %vm291_vm0, %v289_v12, 0.0  ;;  %v313_v15 = vsel %vm291_vm0, %v290_v13, 0.0  ;;  %769 = vmatpush3.bf16.msra.mxu0 %v797_v59 }
  0x14   : > { %785 = vmatpush3.bf16.msra.mxu1 %v797_v59 }
  0x16   : > { %296 = vadd.xlane.f32.xlu0 %v295_v6 }
  0x17   : > { %308 = vadd.xlane.f32.xlu1 %v307_v7 }
  0x1a   : > { %299 = vadd.xlane.f32.xlu0 %v298_v10 }
  0x1b   : > { %302 = vadd.xlane.f32.xlu1 %v301_v11 }
  0x1e   : > { %311 = vadd.xlane.f32.xlu0 %v310_v14 }
  0x1f   : > { %314 = vadd.xlane.f32.xlu1 %v313_v15 }
  0x9f   : > { %v294_v16 = vpop.xlane.xlu0 %293 }
  0xa0   : > { %v306_v17 = vpop.xlane.xlu1 %305  ;;  %v317_v18 = vmul.f32 0.015625, %v294_v16 }
  0xa1   : > { %v321_v19 = vmul.f32 0.015625, %v306_v17 }
  0xa2   : > { %v902_v20 = vsub.f32 %v283_v0, %v317_v18 }
  0xa3   : > { %v904_v21 = vsub.f32 %v287_v1, %v321_v19  ;;  %v297_v22 = vpop.xlane.xlu0 %296 }
  0xa4   : > { %v309_v23 = vpop.xlane.xlu1 %308  ;;  %v318_v24 = vmul.f32 0.015625, %v297_v22  ;;  %v333_v26 = vmul.f32 %v902_v20, %v902_v20 }
  0xa5   : > { %v322_v25 = vmul.f32 0.015625, %v309_v23  ;;  %v337_v27 = vmul.f32 %v904_v21, %v904_v21  ;;  %v739_v23 = vld [vmem:[%s1040_s1] ss:$0 sm:$0xff] }
  0xa6   : > { %v910_v28 = vsub.f32 %v284_v2, %v318_v24  ;;  %v341_v30 = vsel %vm291_vm0, %v333_v26, 0.0 }
  0xa7   : > { %v912_v29 = vsub.f32 %v288_v5, %v322_v25  ;;  %342 = vadd.xlane.f32.xlu0 %v341_v30  ;;  %v300_v31 = vpop.xlane.xlu0 %299  ;;  %v353_v33 = vsel %vm291_vm0, %v337_v27, 0.0 }
  0xa8   : > { %v303_v32 = vpop.xlane.xlu1 %302  ;;  %v319_v34 = vmul.f32 0.015625, %v300_v31  ;;  %v334_v36 = vmul.f32 %v910_v28, %v910_v28  ;;  %v740_v31 = vld [vmem:[%s1041_s2] ss:$0 sm:$0xff] }
  0xa9   : > { %v320_v35 = vmul.f32 0.015625, %v303_v32  ;;  %v338_v37 = vmul.f32 %v912_v29, %v912_v29 }
  0xaa   : > { %v920_v38 = vsub.f32 %v285_v8, %v319_v34  ;;  %v344_v40 = vsel %vm291_vm0, %v334_v36, 0.0 }
  0xab   : > { %v922_v39 = vsub.f32 %v286_v9, %v320_v35  ;;  %354 = vadd.xlane.f32.xlu0 %v353_v33  ;;  %345 = vadd.xlane.f32.xlu1 %v344_v40  ;;  %v312_v41 = vpop.xlane.xlu0 %311  ;;  %v356_v43 = vsel %vm291_vm0, %v338_v37, 0.0 }
  0xac   : > { %v315_v42 = vpop.xlane.xlu1 %314  ;;  %v323_v44 = vmul.f32 0.015625, %v312_v41  ;;  %v335_v46 = vmul.f32 %v920_v38, %v920_v38 }
  0xad   : > { %v324_v45 = vmul.f32 0.015625, %v315_v42  ;;  %v336_v47 = vmul.f32 %v922_v39, %v922_v39 }
  0xae   : > { %v930_v48 = vsub.f32 %v289_v12, %v323_v44  ;;  %v347_v50 = vsel %vm291_vm0, %v335_v46, 0.0 }
  0xaf   : > { %v932_v49 = vsub.f32 %v290_v13, %v324_v45  ;;  %357 = vadd.xlane.f32.xlu1 %v356_v43  ;;  %348 = vadd.xlane.f32.xlu0 %v347_v50  ;;  %v350_v51 = vsel %vm291_vm0, %v336_v47, 0.0 }
  0xb0   : > { %v339_v52 = vmul.f32 %v930_v48, %v930_v48 }
  0xb1   : > { %v340_v53 = vmul.f32 %v932_v49, %v932_v49 }
  0xb2   : > { %v359_v54 = vsel %vm291_vm0, %v339_v52, 0.0 }
  0xb3   : > { %351 = vadd.xlane.f32.xlu1 %v350_v51  ;;  %360 = vadd.xlane.f32.xlu0 %v359_v54  ;;  %v362_v55 = vsel %vm291_vm0, %v340_v53, 0.0 }
  0xb7   : > { %363 = vadd.xlane.f32.xlu1 %v362_v55 }
 0x134   : > { %v343_v60 = vpop.xlane.xlu0 %342 }
 0x135   : > { %v365_v61 = vmul.f32 0.015625, %v343_v60 }
 0x137   : > { %v373_v62 = vadd.f32 1e-05, %v365_v61 }
 0x138   : > { %v346_v63 = vpop.xlane.xlu1 %345  ;;  %v355_v0 = vpop.xlane.xlu0 %354 }
 0x139   : > { %798 = vrsqrt.f32 %v373_v62  ;;  %v366_v1 = vmul.f32 0.015625, %v346_v63  ;;  %v369_v2 = vmul.f32 0.015625, %v355_v0 }
 0x13b   : > { %v374_v3 = vadd.f32 1e-05, %v366_v1  ;;  %v377_v4 = vadd.f32 1e-05, %v369_v2 }
 0x13c   : > { %v358_v5 = vpop.xlane.xlu1 %357  ;;  %v349_v6 = vpop.xlane.xlu0 %348 }
 0x13d   : > { %800 = vrsqrt.f32 %v374_v3  ;;  %v370_v7 = vmul.f32 0.015625, %v358_v5  ;;  %v367_v8 = vmul.f32 0.015625, %v349_v6 }
 0x13e   : > { %802 = vrsqrt.f32 %v377_v4 }
 0x13f   : > { %v378_v9 = vadd.f32 1e-05, %v370_v7  ;;  %v375_v10 = vadd.f32 1e-05, %v367_v8 }
 0x140   : > { %v352_v11 = vpop.xlane.xlu1 %351  ;;  %v361_v12 = vpop.xlane.xlu0 %360 }
 0x141   : > { %804 = vrsqrt.f32 %v378_v9  ;;  %v368_v13 = vmul.f32 0.015625, %v352_v11  ;;  %v371_v14 = vmul.f32 0.015625, %v361_v12 }
 0x142   : > { %806 = vrsqrt.f32 %v375_v10 }
 0x143   : > { %v799_v15 = vpop.eup %798  ;;  %v376_v16 = vadd.f32 1e-05, %v368_v13  ;;  %v379_v17 = vadd.f32 1e-05, %v371_v14 }
 0x144   : > { %v364_v18 = vpop.xlane.xlu1 %363  ;;  %v389_v19 = vmul.f32 %v799_v15, %v902_v20 }
 0x145   : > { %808 = vrsqrt.f32 %v376_v16  ;;  %v372_v22 = vmul.f32 0.015625, %v364_v18 }
 0x146   : > { %810 = vrsqrt.f32 %v379_v17  ;;  %v404_v30 = vmul.f32 %v739_v23, %v389_v19 }
 0x147   : > { %v801_v24 = vpop.eup %800  ;;  %v380_v25 = vadd.f32 1e-05, %v372_v22 }
 0x148   : > { %v803_v26 = vpop.eup %802  ;;  %v390_v27 = vmul.f32 %v801_v24, %v910_v28  ;;  %v419_v35 = vadd.f32 %v740_v31, %v404_v30 }
 0x149   : > { %812 = vrsqrt.f32 %v380_v25  ;;  %v393_v20 = vmul.f32 %v803_v26, %v904_v21 }
 0x14a   : > { %v405_v32 = vmul.f32 %v739_v23, %v390_v27 }
 0x14b   : > { %v805_v33 = vpop.eup %804  ;;  %v408_v40 = vmul.f32 %v739_v23, %v393_v20 }
 0x14c   : > { %v807_v34 = vpop.eup %806  ;;  %v420_v36 = vadd.f32 %v740_v31, %v405_v32  ;;  %v394_v37 = vmul.f32 %v805_v33, %v912_v29 }
 0x14d   : > { %v391_v41 = vmul.f32 %v807_v34, %v920_v38  ;;  %v423_v46 = vadd.f32 %v740_v31, %v408_v40 }
 0x14e   : > { %v427_v42 = vpack.c.bf16 %v420_v36, %v419_v35  ;;  %v409_v28 = vmul.f32 %v739_v23, %v394_v37 }
 0x14f   : > { %v809_v43 = vpop.eup %808  ;;  %v406_v47 = vmul.f32 %v739_v23, %v391_v41 }
 0x150   : > { %v811_v44 = vpop.eup %810  ;;  %v392_v45 = vmul.f32 %v809_v43, %v922_v39  ;;  %770 = vmatprep.mubr.msk.bf16.mxu0 %vm291_vm0, %v427_v42  ;;  %v424_v21 = vadd.f32 %v740_v31, %v409_v28 }
 0x151   : > { %v395_v50 = vmul.f32 %v811_v44, %v930_v48  ;;  %v421_v38 = vadd.f32 %v740_v31, %v406_v47  ;;  %v741_v48 = vld [vmem:[%s1043_s4] ss:$0 sm:$0xff] }
 0x152   : > { %v429_v51 = vpack.c.bf16 %v424_v21, %v423_v46  ;;  %v407_v52 = vmul.f32 %v739_v23, %v392_v45 }
 0x153   : > { %v813_v53 = vpop.eup %812  ;;  %v410_v55 = vmul.f32 %v739_v23, %v395_v50 }
 0x154   : > { %v396_v29 = vmul.f32 %v813_v53, %v932_v49  ;;  %774 = vmatprep.mubr.msk.bf16.mxu1 %vm291_vm0, %v429_v51  ;;  %v422_v54 = vadd.f32 %v740_v31, %v407_v52 }
 0x155   : > { %v425_v39 = vadd.f32 %v740_v31, %v410_v55 }
 0x156   : > { %v428_v56 = vpack.c.bf16 %v422_v54, %v421_v38  ;;  %v411_v57 = vmul.f32 %v739_v23, %v396_v29 }
 0x158   : > { %771 = vmatmul.mubr.msk.bf16.vlgmr.msra.gmra.mrb[0].mxu0 %vm291_vm0, %v428_v56  ;;  %v426_v58 = vadd.f32 %v740_v31, %v411_v57 }
 0x15a   : > { %v430_v59 = vpack.c.bf16 %v426_v58, %v425_v39 }
 0x15c   : > { %775 = vmatmul.mubr.msk.bf16.vlgmr.msra.gmra.mrb[0].mxu1 %vm291_vm0, %v430_v59 }
 0x22b   : > { %v772_v60 = vpop.f32.mrb[0].mxu0 }
 0x22c   : > { %v525_v49 = vadd.f32 %v772_v60, %v741_v48  ;;  %v516_v61 = vpop.f32.mrb[1].mxu0 }
 0x22d   : > { %v773_v62 = vpop.f32.mrb[2].mxu0  ;;  %v517_v2 = vadd.f32 %v741_v48, %v516_v61 }
 0x22e   : > { %v528_v63 = vadd.f32 %v773_v62, %v741_v48  ;;  %551 = vadd.xlane.f32.xlu0 %v525_v49  ;;  %v519_v0 = vpop.f32.mrb[3].mxu0 }
 0x22f   : > { %v776_v1 = vpop.f32.mrb[0].mxu1  ;;  %v520_v5 = vadd.f32 %v741_v48, %v519_v0 }
 0x230   : > { %553 = vadd.xlane.f32.xlu1 %v528_v63  ;;  %v532_v3 = vpop.f32.mrb[1].mxu1  ;;  %v541_v9 = vadd.f32 %v776_v1, %v741_v48  ;;  %v750_v1 = vld [vmem:[%s1044_s5] ss:$0 sm:$0xff] }
 0x231   : > { %v777_v4 = vpop.f32.mrb[2].mxu1  ;;  %v533_v7 = vadd.f32 %v741_v48, %v532_v3 }
 0x232   : > { %547 = vadd.xlane.f32.xlu0 %v517_v2  ;;  %v535_v6 = vpop.f32.mrb[3].mxu1  ;;  %v544_v10 = vadd.f32 %v777_v4, %v741_v48 }
 0x233   : > { %v536_v8 = vadd.f32 %v741_v48, %v535_v6  ;;  %v751_v6 = vld [vmem:[%s1045_s6] ss:$0 sm:$0xff] }
 0x234   : > { %549 = vadd.xlane.f32.xlu1 %v520_v5 }
 0x236   : > { %555 = vadd.xlane.f32.xlu0 %v533_v7 }
 0x238   : > { %557 = vadd.xlane.f32.xlu1 %v536_v8 }
 0x23a   : > { %559 = vadd.xlane.f32.xlu0 %v541_v9 }
 0x23c   : > { %561 = vadd.xlane.f32.xlu1 %v544_v10 }
 0x2bb   : > { %v552_v11 = vpop.xlane.xlu0 %551 }
 0x2bc   : > { %v566_v12 = vmul.f32 0.0078125, %v552_v11 }
 0x2bd   : > { %v554_v13 = vpop.xlane.xlu1 %553 }
 0x2be   : > { %v975_v14 = vsub.f32 %v525_v49, %v566_v12  ;;  %v567_v15 = vmul.f32 0.0078125, %v554_v13 }
 0x2bf   : > { %v548_v16 = vpop.xlane.xlu0 %547 }
 0x2c0   : > { %v977_v17 = vsub.f32 %v528_v63, %v567_v15  ;;  %v564_v18 = vmul.f32 0.0078125, %v548_v16  ;;  %v582_v19 = vmul.f32 %v975_v14, %v975_v14 }
 0x2c1   : > { %v550_v22 = vpop.xlane.xlu1 %549 }
 0x2c2   : > { %v981_v23 = vsub.f32 %v517_v2, %v564_v18  ;;  %v565_v24 = vmul.f32 0.0078125, %v550_v22  ;;  %592 = vadd.xlane.f32.xlu0 %v582_v19  ;;  %v583_v25 = vmul.f32 %v977_v17, %v977_v17 }
 0x2c3   : > { %v556_v26 = vpop.xlane.xlu0 %555 }
 0x2c4   : > { %v985_v27 = vsub.f32 %v520_v5, %v565_v24  ;;  %v568_v30 = vmul.f32 0.0078125, %v556_v26  ;;  %594 = vadd.xlane.f32.xlu1 %v583_v25  ;;  %v580_v31 = vmul.f32 %v981_v23, %v981_v23 }
 0x2c5   : > { %v558_v20 = vpop.xlane.xlu1 %557 }
 0x2c6   : > { %v989_v32 = vsub.f32 %v533_v7, %v568_v30  ;;  %v569_v33 = vmul.f32 0.0078125, %v558_v20  ;;  %588 = vadd.xlane.f32.xlu0 %v580_v31  ;;  %v581_v34 = vmul.f32 %v985_v27, %v985_v27 }
 0x2c7   : > { %v560_v35 = vpop.xlane.xlu0 %559 }
 0x2c8   : > { %v993_v36 = vsub.f32 %v536_v8, %v569_v33  ;;  %v570_v37 = vmul.f32 0.0078125, %v560_v35  ;;  %590 = vadd.xlane.f32.xlu1 %v581_v34  ;;  %v584_v40 = vmul.f32 %v989_v32, %v989_v32 }
 0x2c9   : > { %v562_v41 = vpop.xlane.xlu1 %561 }
 0x2ca   : > { %v997_v42 = vsub.f32 %v541_v9, %v570_v37  ;;  %v571_v28 = vmul.f32 0.0078125, %v562_v41  ;;  %596 = vadd.xlane.f32.xlu0 %v584_v40  ;;  %v585_v43 = vmul.f32 %v993_v36, %v993_v36 }
 0x2cc   : > { %v1001_v44 = vsub.f32 %v544_v10, %v571_v28  ;;  %598 = vadd.xlane.f32.xlu1 %v585_v43  ;;  %v586_v45 = vmul.f32 %v997_v42, %v997_v42 }
 0x2ce   : > { %600 = vadd.xlane.f32.xlu0 %v586_v45  ;;  %v587_v46 = vmul.f32 %v1001_v44, %v1001_v44 }
 0x2d0   : > { %602 = vadd.xlane.f32.xlu1 %v587_v46 }
 0x34f   : > { %v593_v21 = vpop.xlane.xlu0 %592 }
 0x350   : > { %v606_v47 = vmul.f32 0.0078125, %v593_v21 }
 0x351   : > { %v595_v50 = vpop.xlane.xlu1 %594 }
 0x352   : > { %v614_v51 = vadd.f32 1e-05, %v606_v47  ;;  %v607_v52 = vmul.f32 0.0078125, %v595_v50 }
 0x353   : > { %v589_v53 = vpop.xlane.xlu0 %588 }
 0x354   : > { %814 = vrsqrt.f32 %v614_v51  ;;  %v615_v29 = vadd.f32 1e-05, %v607_v52  ;;  %v604_v38 = vmul.f32 0.0078125, %v589_v53 }
 0x355   : > { %v591_v54 = vpop.xlane.xlu1 %590 }
 0x356   : > { %816 = vrsqrt.f32 %v615_v29  ;;  %v612_v55 = vadd.f32 1e-05, %v604_v38  ;;  %v605_v56 = vmul.f32 0.0078125, %v591_v54 }
 0x357   : > { %v597_v57 = vpop.xlane.xlu0 %596 }
 0x358   : > { %818 = vrsqrt.f32 %v612_v55  ;;  %v613_v39 = vadd.f32 1e-05, %v605_v56  ;;  %v608_v58 = vmul.f32 0.0078125, %v597_v57 }
 0x359   : > { %v599_v59 = vpop.xlane.xlu1 %598 }
 0x35a   : > { %820 = vrsqrt.f32 %v613_v39  ;;  %v616_v48 = vadd.f32 1e-05, %v608_v58  ;;  %v609_v60 = vmul.f32 0.0078125, %v599_v59 }
 0x35b   : > { %v601_v49 = vpop.xlane.xlu0 %600 }
 0x35c   : > { %822 = vrsqrt.f32 %v616_v48  ;;  %v617_v61 = vadd.f32 1e-05, %v609_v60  ;;  %v610_v62 = vmul.f32 0.0078125, %v601_v49 }
 0x35d   : > { %v603_v63 = vpop.xlane.xlu1 %602 }
 0x35e   : > { %v815_v0 = vpop.eup %814  ;;  %824 = vrsqrt.f32 %v617_v61  ;;  %v618_v2 = vadd.f32 1e-05, %v610_v62  ;;  %v611_v3 = vmul.f32 0.0078125, %v603_v63 }
 0x35f   : > { %v630_v4 = vmul.f32 %v815_v0, %v975_v14 }
 0x360   : > { %v817_v5 = vpop.eup %816  ;;  %826 = vrsqrt.f32 %v618_v2  ;;  %v619_v7 = vadd.f32 1e-05, %v611_v3 }
 0x361   : > { %v645_v8 = vmul.f32 %v750_v1, %v630_v4  ;;  %v631_v9 = vmul.f32 %v817_v5, %v977_v17 }
 0x362   : > { %v819_v10 = vpop.eup %818  ;;  %828 = vrsqrt.f32 %v619_v7 }
 0x363   : > { %v660_v11 = vadd.f32 %v751_v6, %v645_v8  ;;  %v646_v12 = vmul.f32 %v750_v1, %v631_v9  ;;  %v628_v13 = vmul.f32 %v819_v10, %v981_v23 }
 0x364   : > { %v821_v14 = vpop.eup %820 }
 0x365   : > { %668 = vst [vmem:[%s1020_s8 + $0x10] sm:$0xff] %v660_v11  ;;  %v661_v15 = vadd.f32 %v751_v6, %v646_v12  ;;  %v643_v16 = vmul.f32 %v750_v1, %v628_v13  ;;  %v629_v17 = vmul.f32 %v821_v14, %v985_v27 }
 0x366   : > { %v823_v18 = vpop.eup %822 }
 0x367   : > { %669 = vst [vmem:[%s1020_s8 + $0x18] sm:$0xff] %v661_v15  ;;  %v658_v19 = vadd.f32 %v751_v6, %v643_v16  ;;  %v644_v22 = vmul.f32 %v750_v1, %v629_v17  ;;  %v632_v24 = vmul.f32 %v823_v18, %v989_v32 }
 0x368   : > { %v825_v25 = vpop.eup %824 }
 0x369   : > { %666 = vst [vmem:[%s1020_s8] sm:$0xff] %v658_v19  ;;  %v659_v26 = vadd.f32 %v751_v6, %v644_v22  ;;  %v647_v23 = vmul.f32 %v750_v1, %v632_v24  ;;  %v633_v30 = vmul.f32 %v825_v25, %v993_v36 }
 0x36a   : > { %v827_v31 = vpop.eup %826 }
 0x36b   : > { %667 = vst [vmem:[%s1020_s8 + $0x8] sm:$0xff] %v659_v26  ;;  %v662_v20 = vadd.f32 %v751_v6, %v647_v23  ;;  %v648_v27 = vmul.f32 %v750_v1, %v633_v30  ;;  %v634_v33 = vmul.f32 %v827_v31, %v997_v42 }
 0x36c   : > { %v829_v34 = vpop.eup %828 }
 0x36d   : > { %670 = vst [vmem:[%s1020_s8 + $0x20] sm:$0xff] %v662_v20  ;;  %v663_v35 = vadd.f32 %v751_v6, %v648_v27  ;;  %v649_v37 = vmul.f32 %v750_v1, %v634_v33  ;;  %v635_v32 = vmul.f32 %v829_v34, %v1001_v44 }
 0x36f   : > { %671 = vst [vmem:[%s1020_s8 + $0x28] sm:$0xff] %v663_v35  ;;  %v664_v40 = vadd.f32 %v751_v6, %v649_v37  ;;  %v650_v41 = vmul.f32 %v750_v1, %v635_v32 }
 0x371   : > { %672 = vst [vmem:[%s1020_s8 + $0x30] sm:$0xff] %v664_v40  ;;  %v665_v28 = vadd.f32 %v751_v6, %v650_v41 }
 0x373   : > { %673 = vst [vmem:[%s1020_s8 + $0x38] sm:$0xff] %v665_v28 }
 0x374 PF: > { %s17_s24 = sadd.s32 1, %s836_s24  }
 0x375   : > { %p14_p4 = scmp.ge.s32.totalorder %s17_s24, 4  }
 0x377   :  { %16 = sbr.rel (!%p14_p4) target bundleno = 1 (0x1), region = 78 }

</bundles_post_ra>
